<compile_context>
chip_gen: v7x
topology: tpu7x:2x2x1
jax: 0.10.0
libtpu: 0.0.40
codegen_flags: <defaults>
</compile_context>

<pallas_src>
import jax
import jax.numpy as jnp
from jax.experimental import pallas as pl
from jax.experimental.pallas import tpu as pltpu


def _make_quadruplet_kernel(epsilon1: float, epsilon2: float, B: int, TB: int):
    def kernel(a_ref, p_ref, n1_ref, n2_ref, o_ref):
        # Per-tile cast to f32 (free VPU op; mandatory compute dtype on v5e).
        a = a_ref[...].astype(jnp.float32)
        p = p_ref[...].astype(jnp.float32)
        n1 = n1_ref[...].astype(jnp.float32)
        n2 = n2_ref[...].astype(jnp.float32)

        # Squared L2 distances summed over the feature axis (XLU reduce; rides
        # in a free slot, HBM bandwidth is the binding resource).
        d_pos = jnp.sum((a - p) ** 2, axis=1, keepdims=True)       # (TB, 1)
        d_neg = jnp.sum((a - n1) ** 2, axis=1, keepdims=True)      # (TB, 1)
        d_neg_b = jnp.sum((n1 - n2) ** 2, axis=1, keepdims=True)   # (TB, 1)

        loss = (jnp.maximum(epsilon1 + d_pos - d_neg, 0.0)
                + jnp.maximum(epsilon2 + d_pos - d_neg_b, 0.0))    # (TB, 1)

        # Mask tail rows of a partial last tile (where -> 0 also kills any
        # NaN/Inf coming from the undefined padded region of the block).
        if B % TB != 0:
            row = (pl.program_id(0) * TB
                   + jax.lax.broadcasted_iota(jnp.int32, (TB, 1), 0))
            loss = jnp.where(row < B, loss, 0.0)

        # One f32 partial sum per tile; broadcast to a lane-dense (1,8,128)
        # block so the store is a plain unmasked vst.
        partial = jnp.sum(loss)
        o_ref[...] = jnp.broadcast_to(partial, (1, 8, 128)).astype(jnp.float32)

    return kernel


def quadruplet_loss(anchor, positive, negative1, negative2,
                    epsilon1: float = 1.0, epsilon2: float = 0.5,
                    block_rows: int | None = None):
    """Pallas TPU implementation of QuadrupletLoss.forward. Returns a scalar."""
    assert anchor.shape == positive.shape == negative1.shape == negative2.shape
    assert anchor.ndim == 2
    B, D = anchor.shape
    itemsize = jnp.dtype(anchor.dtype).itemsize

    # Pick a batch tile: 4 input streams x 2 pipeline buffers should stay
    # around ~24 MiB of VMEM (safe for v7x's 64 MiB physical VMEM while still
    # being large enough to hit ~85% of HBM roofline on v5e/v6e).
    if block_rows is None:
        budget_bytes = 24 * 1024 * 1024
        rows = budget_bytes // (4 * 2 * D * itemsize)
        tb = int(max(8, min(1024, (rows // 8) * 8)))
    else:
        tb = int(block_rows)
    if B <= tb:
        tb = B                      # single full-extent tile (exempt from 8x128 rule)
    else:
        tb = max(8, (tb // 8) * 8)  # keep sublane dim a multiple of 8

    num_tiles = pl.cdiv(B, tb)
    kernel = _make_quadruplet_kernel(float(epsilon1), float(epsilon2), B, tb)

    in_spec = pl.BlockSpec((tb, D), lambda i: (i, 0))

    partials = pl.pallas_call(
        kernel,
        grid=(num_tiles,),
        in_specs=[in_spec, in_spec, in_spec, in_spec],
        out_specs=pl.BlockSpec((1, 8, 128), lambda i: (i, 0, 0)),
        out_shape=jax.ShapeDtypeStruct((num_tiles, 8, 128), jnp.float32),
        compiler_params=pltpu.CompilerParams(
            dimension_semantics=("parallel",),       # megacore sharding on v7x
            vmem_limit_bytes=48 * 1024 * 1024,       # > v5e's 16 MiB default, < v7x 64 MiB
        ),
    )(anchor, positive, negative1, negative2)

    # Finish the mean outside the kernel: sum of per-tile partials / B.
    return jnp.sum(partials[:, 0, 0]) / B


def quadruplet_loss_ref(anchor, positive, negative1, negative2,
                        epsilon1=1.0, epsilon2=0.5):
    """Pure-JAX reference mirroring the PyTorch module."""
    a = anchor.astype(jnp.float32)
    p = positive.astype(jnp.float32)
    n1 = negative1.astype(jnp.float32)
    n2 = negative2.astype(jnp.float32)
    d_pos = jnp.sum((a - p) ** 2, axis=1)
    d_neg = jnp.sum((a - n1) ** 2, axis=1)
    d_neg_b = jnp.sum((n1 - n2) ** 2, axis=1)
    loss = (jax.nn.relu(epsilon1 + d_pos - d_neg)
            + jax.nn.relu(epsilon2 + d_pos - d_neg_b))
    return jnp.mean(loss)


if __name__ == "__main__":
    key = jax.random.PRNGKey(0)

    # Case 1: small embedding batch consistent with the module's forward.
    B, D = 8, 32
    k1, k2, k3, k4 = jax.random.split(key, 4)
    anchor = jax.random.normal(k1, (B, D), dtype=jnp.float32)
    positive = jax.random.normal(k2, (B, D), dtype=jnp.float32)
    negative1 = jax.random.normal(k3, (B, D), dtype=jnp.float32)
    negative2 = jax.random.normal(k4, (B, D), dtype=jnp.float32)

    out = jax.block_until_ready(quadruplet_loss(anchor, positive, negative1, negative2))
    ref = quadruplet_loss_ref(anchor, positive, negative1, negative2)
    assert jnp.allclose(out, ref, rtol=1e-5, atol=1e-5), (out, ref)

    # Case 2: exercise the tiled/masked path (B not a multiple of the tile).
    B2, D2 = 20, 64
    k5, k6, k7, k8 = jax.random.split(jax.random.PRNGKey(1), 4)
    a2 = jax.random.normal(k5, (B2, D2), dtype=jnp.float32)
    p2 = jax.random.normal(k6, (B2, D2), dtype=jnp.float32)
    n12 = jax.random.normal(k7, (B2, D2), dtype=jnp.float32)
    n22 = jax.random.normal(k8, (B2, D2), dtype=jnp.float32)

    out2 = jax.block_until_ready(
        quadruplet_loss(a2, p2, n12, n22, block_rows=8))
    ref2 = quadruplet_loss_ref(a2, p2, n12, n22)
    assert jnp.allclose(out2, ref2, rtol=1e-5, atol=1e-5), (out2, ref2)

    print("KERNEL_OK")
</pallas_src>

<mosaic_0001>
module attributes {stable_mosaic.version = 11 : i64} {
  func.func @kernel(%arg0: i32, %arg1: memref<8x32xf32, #tpu.memory_space<vmem>>, %arg2: memref<8x32xf32, #tpu.memory_space<vmem>>, %arg3: memref<8x32xf32, #tpu.memory_space<vmem>>, %arg4: memref<8x32xf32, #tpu.memory_space<vmem>>, %arg5: memref<1x8x128xf32, #tpu.memory_space<vmem>>) attributes {dimension_semantics = [#tpu.dimension_semantics<parallel>], iteration_bounds = array<i64: 1>, scalar_prefetch = 0 : i64, scratch_operands = 0 : i64, tpu.core_type = #tpu.core_type<tc>, window_params = [{transform_indices = @transform_0, window_bounds = array<i64: 8, 32>}, {transform_indices = @transform_1, window_bounds = array<i64: 8, 32>}, {transform_indices = @transform_2, window_bounds = array<i64: 8, 32>}, {transform_indices = @transform_3, window_bounds = array<i64: 8, 32>}, {transform_indices = @transform_4, window_bounds = array<i64: 1, 8, 128>}]} {
    %c0 = arith.constant 0 : index
    %c0_0 = arith.constant 0 : index
    %0 = vector.load %arg1[%c0, %c0_0] : memref<8x32xf32, #tpu.memory_space<vmem>>, vector<8x32xf32>
    %c0_1 = arith.constant 0 : index
    %c0_2 = arith.constant 0 : index
    %1 = vector.load %arg2[%c0_1, %c0_2] : memref<8x32xf32, #tpu.memory_space<vmem>>, vector<8x32xf32>
    %c0_3 = arith.constant 0 : index
    %c0_4 = arith.constant 0 : index
    %2 = vector.load %arg3[%c0_3, %c0_4] : memref<8x32xf32, #tpu.memory_space<vmem>>, vector<8x32xf32>
    %c0_5 = arith.constant 0 : index
    %c0_6 = arith.constant 0 : index
    %3 = vector.load %arg4[%c0_5, %c0_6] : memref<8x32xf32, #tpu.memory_space<vmem>>, vector<8x32xf32>
    %4 = arith.subf %0, %1 : vector<8x32xf32>
    %5 = arith.mulf %4, %4 : vector<8x32xf32>
    %cst = arith.constant dense<0.000000e+00> : vector<8xf32>
    %6 = vector.multi_reduction <add>, %5, %cst [1] : vector<8x32xf32> to vector<8xf32>
    %7 = vector.shape_cast %6 : vector<8xf32> to vector<8x1xf32>
    %8 = arith.subf %0, %2 : vector<8x32xf32>
    %9 = arith.mulf %8, %8 : vector<8x32xf32>
    %cst_7 = arith.constant dense<0.000000e+00> : vector<8xf32>
    %10 = vector.multi_reduction <add>, %9, %cst_7 [1] : vector<8x32xf32> to vector<8xf32>
    %11 = vector.shape_cast %10 : vector<8xf32> to vector<8x1xf32>
    %12 = arith.subf %2, %3 : vector<8x32xf32>
    %13 = arith.mulf %12, %12 : vector<8x32xf32>
    %cst_8 = arith.constant dense<0.000000e+00> : vector<8xf32>
    %14 = vector.multi_reduction <add>, %13, %cst_8 [1] : vector<8x32xf32> to vector<8xf32>
    %15 = vector.shape_cast %14 : vector<8xf32> to vector<8x1xf32>
    %cst_9 = arith.constant 1.000000e+00 : f32
    %16 = vector.broadcast %cst_9 : f32 to vector<8x1xf32>
    %17 = arith.addf %16, %7 : vector<8x1xf32>
    %18 = arith.subf %17, %11 : vector<8x1xf32>
    %cst_10 = arith.constant 0.000000e+00 : f32
    %19 = vector.broadcast %cst_10 : f32 to vector<8x1xf32>
    %20 = arith.maximumf %18, %19 : vector<8x1xf32>
    %cst_11 = arith.constant 5.000000e-01 : f32
    %21 = vector.broadcast %cst_11 : f32 to vector<8x1xf32>
    %22 = arith.addf %21, %7 : vector<8x1xf32>
    %23 = arith.subf %22, %15 : vector<8x1xf32>
    %cst_12 = arith.constant 0.000000e+00 : f32
    %24 = vector.broadcast %cst_12 : f32 to vector<8x1xf32>
    %25 = arith.maximumf %23, %24 : vector<8x1xf32>
    %26 = arith.addf %20, %25 : vector<8x1xf32>
    %27 = vector.shape_cast %26 : vector<8x1xf32> to vector<1x8x1xf32>
    %cst_13 = arith.constant dense<0.000000e+00> : vector<1xf32>
    %28 = vector.multi_reduction <add>, %27, %cst_13 [1, 2] : vector<1x8x1xf32> to vector<1xf32>
    %29 = vector.shape_cast %28 : vector<1xf32> to vector<1x1x1xf32>
    %30 = vector.extract %29[0, 0, 0] : f32 from vector<1x1x1xf32>
    %31 = vector.broadcast %30 : f32 to vector<1x8x128xf32>
    %c0_14 = arith.constant 0 : index
    %c0_15 = arith.constant 0 : index
    %c0_16 = arith.constant 0 : index
    %32 = vector.load %arg5[%c0_14, %c0_15, %c0_16] : memref<1x8x128xf32, #tpu.memory_space<vmem>>, vector<1x8x128xf32>
    tpu.vector_store %arg5[%c0_14, %c0_15, %c0_16], %31 {strides = array<i32>} : memref<1x8x128xf32, #tpu.memory_space<vmem>>, vector<1x8x128xf32>,
    return
  }
  func.func @transform_0(%arg0: i32) -> (i32, i32) {
    %c0_i32 = arith.constant 0 : i32
    %c0_i32_0 = arith.constant 0 : i32
    return %arg0, %c0_i32 : i32, i32
  }
  func.func @transform_1(%arg0: i32) -> (i32, i32) {
    %c0_i32 = arith.constant 0 : i32
    %c0_i32_0 = arith.constant 0 : i32
    return %arg0, %c0_i32 : i32, i32
  }
  func.func @transform_2(%arg0: i32) -> (i32, i32) {
    %c0_i32 = arith.constant 0 : i32
    %c0_i32_0 = arith.constant 0 : i32
    return %arg0, %c0_i32 : i32, i32
  }
  func.func @transform_3(%arg0: i32) -> (i32, i32) {
    %c0_i32 = arith.constant 0 : i32
    %c0_i32_0 = arith.constant 0 : i32
    return %arg0, %c0_i32 : i32, i32
  }
  func.func @transform_4(%arg0: i32) -> (i32, i32, i32) {
    %c0_i32 = arith.constant 0 : i32
    %c0_i32_0 = arith.constant 0 : i32
    %c0_i32_1 = arith.constant 0 : i32
    return %arg0, %c0_i32, %c0_i32_0 : i32, i32, i32
  }
}

</mosaic_0001>

<bundles_post_ra>
// kernel: tpu_custom_call.1
= control target key start
LH: loop header
LB: loop body
LE: loop exit
PB: predicated region body
PF: predicated region fallthrough
CT: control target
= control target key end

     0   :  { %9 = vsyncpa [#allocation3], 0  ;;  %s289_s0 = inlined_call_operand.hbm [shape: f32[8,32], index: 0, kind: input, shape index: {}]   ;;  %s290_s1 = inlined_call_operand.hbm [shape: f32[8,32], index: 1, kind: input, shape index: {}]   ;;  %s291_s2 = inlined_call_operand.hbm [shape: f32[8,32], index: 2, kind: input, shape index: {}]   ;;  %s292_s3 = inlined_call_operand.vmem [shape: f32[8,32], index: 3, kind: input, shape index: {}]   ;;  %s293_s4 = inlined_call_operand.hbm [shape: f32[1,8,128], index: 4, kind: output, shape index: {}]  }
   0x1   :  { %10 = vsyncpa [#allocation6], 0 }
   0x2   :  { %11 = vsyncpa [#allocation4], 0  ;;  %s209_s15 = smov [#allocation5]   ;;  %s210_s17 = smov [#allocation2]  }
   0x3   :  { %s28_s16 = sshll.u32 %s209_s15, 4  ;;  %s18_s18 = sshll.u32 %s210_s17, 4  ;;  %s29_s16 = int_to_ptr.vmem [resolvable:$true] %s28_s16  ;;  %s19_s18 = int_to_ptr.vmem [resolvable:$true] %s18_s18 }
   0x4   :  { %s115_s21 = scalar_lea.hbm %s290_s1, 128 }
   0x5   :  { %p116_p0 = scmp.ne.s32.totalorder %s290_s1, %s115_s21  ;;  %p119_p1 = scmp.lt.u32.totalorder %s115_s21, %s290_s1 }
   0x7   :  { %p121_p2 = pnand %p119_p1, %p116_p0 }
   0x9   :  { %124 = shalt.err (!%p121_p2)
}
   0xa   :  { %s125_s26 = scalar_lea.vmem %s29_s16, 128  ;;  %p130_p4 = scmp.lt.s32.totalorder %s29_s16, %s29_s16 }
   0xb   :  { %p126_p3 = scmp.ne.s32.totalorder %s29_s16, %s125_s26  ;;  %p131_p5 = scmp.lt.s32.totalorder %s125_s26, %s125_s26 }
   0xd   :  { %p132_p6 = por %p131_p5, %p130_p4 }
   0xf   :  { %p133_p7 = pnand %p132_p6, %p126_p3 }
  0x11   :  { %136 = shalt.err (!%p133_p7)
}
  0x12   :  { %31 = dma.hbm_to_vmem [thread:$0]  %s290_s1, 128, %s29_s16, [#allocation6]  }
  0x13   :  { %s137_s5 = scalar_lea.hbm %s289_s0, 128 }
  0x14   :  { %p138_p8 = scmp.ne.s32.totalorder %s289_s0, %s137_s5  ;;  %p141_p9 = scmp.lt.u32.totalorder %s137_s5, %s289_s0 }
  0x16   :  { %p143_p10 = pnand %p141_p9, %p138_p8 }
  0x18   :  { %146 = shalt.err (!%p143_p10)
}
  0x19   :  { %s147_s10 = scalar_lea.vmem %s19_s18, 128  ;;  %p152_p12 = scmp.lt.s32.totalorder %s19_s18, %s19_s18 }
  0x1a   :  { %p148_p11 = scmp.ne.s32.totalorder %s19_s18, %s147_s10  ;;  %p153_p13 = scmp.lt.s32.totalorder %s147_s10, %s147_s10 }
  0x1c   :  { %p154_p0 = por %p153_p13, %p152_p12 }
  0x1e   :  { %p155_p1 = pnand %p154_p0, %p148_p11 }
  0x20   :  { %158 = shalt.err (!%p155_p1)
}
  0x21   :  { %21 = dma.hbm_to_vmem [thread:$0]  %s289_s0, 128, %s19_s18, [#allocation3]  }
  0x22   :  { %s211_s12 = smov [#allocation7]   ;;  %s159_s16 = scalar_lea.hbm %s291_s2, 128 }
  0x23   :  { %s38_s13 = sshll.u32 %s211_s12, 4  ;;  %p160_p2 = scmp.ne.s32.totalorder %s291_s2, %s159_s16  ;;  %s39_s13 = int_to_ptr.vmem [resolvable:$true] %s38_s13 }
  0x24   :  { %p163_p3 = scmp.lt.u32.totalorder %s159_s16, %s291_s2 }
  0x26   :  { %p165_p4 = pnand %p163_p3, %p160_p2 }
  0x28   :  { %168 = shalt.err (!%p165_p4)
}
  0x29   :  { %s169_s22 = scalar_lea.vmem %s39_s13, 128  ;;  %p174_p6 = scmp.lt.s32.totalorder %s39_s13, %s39_s13 }
  0x2a   :  { %p170_p5 = scmp.ne.s32.totalorder %s39_s13, %s169_s22  ;;  %p175_p7 = scmp.lt.s32.totalorder %s169_s22, %s169_s22 }
  0x2c   :  { %p176_p8 = por %p175_p7, %p174_p6 }
  0x2e   :  { %p177_p9 = pnand %p176_p8, %p170_p5 }
  0x30   :  { %180 = shalt.err (!%p177_p9)
}
  0x31   :  { %41 = dma.hbm_to_vmem [thread:$0]  %s291_s2, 128, %s39_s13, [#allocation6]  }
  0x32   :  { %203 = dma.done.wait [#allocation3], 128  }
  0x33   :  { %204 = vsyncadd [#allocation3], 4294967168 }
  0x34   :  { %205 = dma.done.wait [#allocation6], 256  }
  0x35   :  { %206 = vsyncadd [#allocation6], 4294967040  ;;  %v53_v0 = vld [vmem:[#allocation2] sm:$0xff]  ;;  %v54_v1 = vld [vmem:[#allocation5] sm:$0xff]  ;;  %vm59_vm0 = vcmask 261120   ;;  %vm80_vm1 = vcmask 7168  }
  0x36   :  { %v55_v2 = vld [vmem:[#allocation7] sm:$0xff]  ;;  %v57_v3 = vsub.f32 %v53_v0, %v54_v1  ;;  %v56_v4 = vld [vmem:[%s292_s3] sm:$0xff]  ;;  %s212_s2 = smov [#allocation8]  }
  0x37   :  { %v63_v5 = vsub.f32 %v53_v0, %v55_v2  ;;  %v68_v6 = vsub.f32 %v55_v2, %v56_v4  ;;  %s99_s3 = sshll.u32 %s212_s2, 4  ;;  %s100_s3 = int_to_ptr.vmem [resolvable:$true] %s99_s3 }
  0x38   :  { %v58_v7 = vmul.f32 %v57_v3, %v57_v3  ;;  %s181_s26 = scalar_lea.vmem %s100_s3, 128  ;;  %p186_p11 = scmp.lt.s32.totalorder %s100_s3, %s100_s3 }
  0x39   :  { %v64_v8 = vmul.f32 %v63_v5, %v63_v5  ;;  %v69_v9 = vmul.f32 %v68_v6, %v68_v6  ;;  %p182_p10 = scmp.ne.s32.totalorder %s100_s3, %s181_s26  ;;  %p187_p12 = scmp.lt.s32.totalorder %s181_s26, %s181_s26 }
  0x3a   :  { %v60_v10 = vsel %vm59_vm0, %v58_v7, 0.0 }
  0x3b   :  { %61 = vadd.xlane.f32.xlu0 %v60_v10  ;;  %v70_v11 = vsel %vm59_vm0, %v69_v9, 0.0  ;;  %v65_v12 = vsel %vm59_vm0, %v64_v8, 0.0  ;;  %p188_p13 = por %p187_p12, %p186_p11 }
  0x3c   :  { %71 = vadd.xlane.f32.xlu1 %v70_v11 }
  0x3d   :  { %p189_p0 = pnand %p188_p13, %p182_p10 }
  0x3f   :  { %66 = vadd.xlane.f32.xlu0 %v65_v12 }
  0xc8   :  { %v62_v13 = vpop.xlane.xlu0 %61 }
  0xc9   :  { %v76_v14 = vadd.f32 0.5, %v62_v13  ;;  %v72_v15 = vpop.xlane.xlu1 %71  ;;  %v73_v16 = vadd.f32 1.0, %v62_v13 }
  0xcb   :  { %v77_v17 = vsub.f32 %v76_v14, %v72_v15 }
  0xcc   :  { %v67_v18 = vpop.xlane.xlu0 %66 }
  0xcd   :  { %v74_v19 = vsub.f32 %v73_v16, %v67_v18  ;;  %v78_v20 = vmax.f32 %v77_v17, 0.0 }
  0xcf   :  { %v75_v21 = vmax.f32 %v74_v19, 0.0 }
  0xd1   :  { %v79_v22 = vadd.f32 %v78_v20, %v75_v21 }
  0xd3   :  { %v81_v23 = vsel %vm80_vm1, %v79_v22, 0.0 }
  0xd4   :  { %82 = vadd.xlane.f32.xlu1 %v81_v23 }
 0x161   :  { %v83_v24 = vpop.xlane.xlu1 %82 }
 0x162   :  { %v84_v25 = vrot.slane %v83_v24, 4 }
 0x164   :  { %v85_v26 = vadd.f32 %v84_v25, %v83_v24 }
 0x166   :  { %v86_v27 = vrot.slane %v85_v26, 2 }
 0x168   :  { %v87_v28 = vadd.f32 %v86_v27, %v85_v26 }
 0x16a   :  { %v88_v29 = vrot.slane %v87_v28, 1 }
 0x16c   :  { %v89_v30 = vadd.f32 %v88_v29, %v87_v28 }
 0x16e   :  { %109 = vpush %v89_v30 }
 0x19f   :  { %s110_s25 = spop %109 }
 0x1a0   :  { %v91_v31 = vstv %s110_s25 }
 0x1a1   :  { %92 = vst [vmem:[#allocation8] sm:$0xff] %v91_v31 }
 0x1a2   :  { %192 = shalt.err (!%p189_p0)
}
 0x1a3   :  { %s193_s29 = scalar_lea.hbm %s293_s4, 128 }
 0x1a4   :  { %p194_p1 = scmp.ne.s32.totalorder %s293_s4, %s193_s29  ;;  %p197_p2 = scmp.lt.u32.totalorder %s193_s29, %s293_s4 }
 0x1a6   :  { %p199_p3 = pnand %p197_p2, %p194_p1 }
 0x1a8   :  { %202 = shalt.err (!%p199_p3)
}
 0x1a9   :  { %102 = dma.vmem_to_hbm [thread:$0]  %s100_s3, 128, %s293_s4, [#allocation4]  }
 0x1aa   :  { %207 = dma.done.wait [#allocation4], 128  }
 0x1ab   :  { %208 = vsyncadd [#allocation4], 4294967168 }
 0x1ac   :  { %106 = vsyncpa [#allocation3], 1 }
 0x1ad   :  { %107 = vsyncpa [#allocation6], 1 }
 0x1ae   :  { %108 = vsyncpa [#allocation4], 1 }

</bundles_post_ra>
